<compile_context>
chip_gen: v7x
topology: tpu7x:2x2x1
jax: 0.10.0
libtpu: 0.0.40
codegen_flags: <defaults>
</compile_context>

<pallas_src>
import jax
import jax.numpy as jnp
from jax import lax
from jax.experimental import pallas as pl
from jax.experimental.pallas import tpu as pltpu

LN_EPS = 1e-5  # nn.LayerNorm default


def _cnn_layernorm_kernel(x_ref, g_ref, b_ref, o_ref):
    # x_ref / o_ref: (TILE_BC, F, TILE_T)  -- F on sublanes, T on lanes.
    # g_ref / b_ref: (1, F, 1), resident (constant index_map).
    x = x_ref[...].astype(jnp.float32)
    mean = jnp.mean(x, axis=1, keepdims=True)               # reduce over F
    centered = x - mean
    var = jnp.mean(centered * centered, axis=1, keepdims=True)
    inv = lax.rsqrt(var + LN_EPS)
    y = centered * inv * g_ref[...].astype(jnp.float32) + b_ref[...].astype(jnp.float32)
    o_ref[...] = y.astype(o_ref.dtype)


def _pick_lane_tile(t, quantum=128, target=1024):
    """Largest multiple of `quantum` that divides t and is <= target; else full t."""
    if t <= target or t % quantum != 0:
        return t
    cand = (target // quantum) * quantum
    while cand >= quantum:
        if t % cand == 0:
            return cand
        cand -= quantum
    return t


def _pick_leading_tile(bc, max_tile):
    """Largest divisor of bc that is <= max_tile (at least 1)."""
    tile = max(1, min(bc, max_tile))
    while bc % tile != 0:
        tile -= 1
    return tile


def cnn_layer_norm(x, gamma, beta, *, target_block_bytes=2 << 20):
    """x: (B, C, n_feats, T) -> (B, C, n_feats, T), LayerNorm over n_feats."""
    b, c, f, t = x.shape
    bc = b * c
    x3 = x.reshape(bc, f, t)            # merge leading dims only -- no transpose
    g3 = gamma.reshape(1, f, 1)
    b3 = beta.reshape(1, f, 1)

    tile_t = _pick_lane_tile(t)
    itemsize = jnp.dtype(x.dtype).itemsize
    slab_bytes = f * tile_t * itemsize
    tile_bc = _pick_leading_tile(bc, target_block_bytes // max(slab_bytes, 1))

    grid = (bc // tile_bc, t // tile_t)

    out = pl.pallas_call(
        _cnn_layernorm_kernel,
        out_shape=jax.ShapeDtypeStruct((bc, f, t), x.dtype),
        grid=grid,
        in_specs=[
            pl.BlockSpec((tile_bc, f, tile_t), lambda i, j: (i, 0, j)),
            pl.BlockSpec((1, f, 1), lambda i, j: (0, 0, 0)),
            pl.BlockSpec((1, f, 1), lambda i, j: (0, 0, 0)),
        ],
        out_specs=pl.BlockSpec((tile_bc, f, tile_t), lambda i, j: (i, 0, j)),
        compiler_params=pltpu.CompilerParams(
            dimension_semantics=("parallel", "parallel"),
        ),
    )(x3, g3, b3)
    return out.reshape(b, c, f, t)


def _reference(x, gamma, beta):
    xt = jnp.transpose(x, (0, 1, 3, 2)).astype(jnp.float32)
    mean = jnp.mean(xt, axis=-1, keepdims=True)
    var = jnp.mean((xt - mean) ** 2, axis=-1, keepdims=True)
    y = (xt - mean) * lax.rsqrt(var + LN_EPS) * gamma + beta
    return jnp.transpose(y, (0, 1, 3, 2)).astype(x.dtype)


if __name__ == "__main__":
    B, C, N_FEATS, T = 2, 4, 16, 16

    key = jax.random.PRNGKey(0)
    kx, kg, kb = jax.random.split(key, 3)
    x = jax.random.normal(kx, (B, C, N_FEATS, T), dtype=jnp.float32)
    gamma = 1.0 + 0.1 * jax.random.normal(kg, (N_FEATS,), dtype=jnp.float32)
    beta = 0.1 * jax.random.normal(kb, (N_FEATS,), dtype=jnp.float32)

    out = jax.block_until_ready(cnn_layer_norm(x, gamma, beta))
    ref = _reference(x, gamma, beta)
    assert out.shape == (B, C, N_FEATS, T)
    assert jnp.allclose(out, ref, atol=1e-5, rtol=1e-5)

    # Also exercise the lane-tiled path (T large, multiple of 128 -> TILE_T=1024).
    B2, C2, F2, T2 = 1, 2, 16, 2048
    x2 = jax.random.normal(jax.random.PRNGKey(1), (B2, C2, F2, T2), dtype=jnp.float32)
    g2 = 1.0 + 0.1 * jax.random.normal(jax.random.PRNGKey(2), (F2,), dtype=jnp.float32)
    b2 = 0.1 * jax.random.normal(jax.random.PRNGKey(3), (F2,), dtype=jnp.float32)
    out2 = jax.block_until_ready(cnn_layer_norm(x2, g2, b2))
    ref2 = _reference(x2, g2, b2)
    assert jnp.allclose(out2, ref2, atol=1e-5, rtol=1e-5)

    print("KERNEL_OK")
</pallas_src>

<mosaic_0001>
module attributes {stable_mosaic.version = 11 : i64} {
  func.func @_cnn_layernorm_kernel(%arg0: i32, %arg1: i32, %arg2: memref<8x16x16xf32, #tpu.memory_space<vmem>>, %arg3: memref<1x16x1xf32, #tpu.memory_space<vmem>>, %arg4: memref<1x16x1xf32, #tpu.memory_space<vmem>>, %arg5: memref<8x16x16xf32, #tpu.memory_space<vmem>>) attributes {dimension_semantics = [#tpu.dimension_semantics<parallel>, #tpu.dimension_semantics<parallel>], iteration_bounds = array<i64: 1, 1>, scalar_prefetch = 0 : i64, scratch_operands = 0 : i64, tpu.core_type = #tpu.core_type<tc>, window_params = [{transform_indices = @transform_0, window_bounds = array<i64: 8, 16, 16>}, {pipeline_mode = #tpu.pipeline_mode<synchronous>, transform_indices = @transform_1, window_bounds = array<i64: 1, 16, 1>}, {pipeline_mode = #tpu.pipeline_mode<synchronous>, transform_indices = @transform_2, window_bounds = array<i64: 1, 16, 1>}, {transform_indices = @transform_3, window_bounds = array<i64: 8, 16, 16>}]} {
    %c0 = arith.constant 0 : index
    %c0_0 = arith.constant 0 : index
    %c0_1 = arith.constant 0 : index
    %0 = vector.load %arg2[%c0, %c0_0, %c0_1] : memref<8x16x16xf32, #tpu.memory_space<vmem>>, vector<8x16x16xf32>
    %cst = arith.constant dense<0.000000e+00> : vector<8x16xf32>
    %1 = vector.multi_reduction <add>, %0, %cst [1] : vector<8x16x16xf32> to vector<8x16xf32>
    %2 = vector.shape_cast %1 : vector<8x16xf32> to vector<8x1x16xf32>
    %cst_2 = arith.constant 1.600000e+01 : f32
    %3 = vector.broadcast %cst_2 : f32 to vector<8x1x16xf32>
    %4 = arith.divf %2, %3 : vector<8x1x16xf32>
    %5 = vector.broadcast %4 : vector<8x1x16xf32> to vector<8x16x16xf32>
    %6 = arith.subf %0, %5 : vector<8x16x16xf32>
    %7 = arith.mulf %6, %6 : vector<8x16x16xf32>
    %cst_3 = arith.constant dense<0.000000e+00> : vector<8x16xf32>
    %8 = vector.multi_reduction <add>, %7, %cst_3 [1] : vector<8x16x16xf32> to vector<8x16xf32>
    %9 = vector.shape_cast %8 : vector<8x16xf32> to vector<8x1x16xf32>
    %cst_4 = arith.constant 1.600000e+01 : f32
    %10 = vector.broadcast %cst_4 : f32 to vector<8x1x16xf32>
    %11 = arith.divf %9, %10 : vector<8x1x16xf32>
    %cst_5 = arith.constant 9.99999974E-6 : f32
    %12 = vector.broadcast %cst_5 : f32 to vector<8x1x16xf32>
    %13 = arith.addf %11, %12 : vector<8x1x16xf32>
    %14 = math.rsqrt %13 : vector<8x1x16xf32>
    %15 = vector.broadcast %14 : vector<8x1x16xf32> to vector<8x16x16xf32>
    %16 = arith.mulf %6, %15 : vector<8x16x16xf32>
    %c0_6 = arith.constant 0 : index
    %c0_7 = arith.constant 0 : index
    %c0_8 = arith.constant 0 : index
    %17 = vector.load %arg3[%c0_6, %c0_7, %c0_8] : memref<1x16x1xf32, #tpu.memory_space<vmem>>, vector<1x16x1xf32>
    %18 = vector.broadcast %17 : vector<1x16x1xf32> to vector<8x16x16xf32>
    %19 = arith.mulf %16, %18 : vector<8x16x16xf32>
    %c0_9 = arith.constant 0 : index
    %c0_10 = arith.constant 0 : index
    %c0_11 = arith.constant 0 : index
    %20 = vector.load %arg4[%c0_9, %c0_10, %c0_11] : memref<1x16x1xf32, #tpu.memory_space<vmem>>, vector<1x16x1xf32>
    %21 = vector.broadcast %20 : vector<1x16x1xf32> to vector<8x16x16xf32>
    %22 = arith.addf %19, %21 : vector<8x16x16xf32>
    %c0_12 = arith.constant 0 : index
    %c0_13 = arith.constant 0 : index
    %c0_14 = arith.constant 0 : index
    %23 = vector.load %arg5[%c0_12, %c0_13, %c0_14] : memref<8x16x16xf32, #tpu.memory_space<vmem>>, vector<8x16x16xf32>
    tpu.vector_store %arg5[%c0_12, %c0_13, %c0_14], %22 {strides = array<i32>} : memref<8x16x16xf32, #tpu.memory_space<vmem>>, vector<8x16x16xf32>,
    return
  }
  func.func @transform_0(%arg0: i32, %arg1: i32) -> (i32, i32, i32) {
    %c0_i32 = arith.constant 0 : i32
    %c0_i32_0 = arith.constant 0 : i32
    return %arg0, %c0_i32, %arg1 : i32, i32, i32
  }
  func.func @transform_1(%arg0: i32, %arg1: i32) -> (i32, i32, i32) {
    %c0_i32 = arith.constant 0 : i32
    %c0_i32_0 = arith.constant 0 : i32
    %c0_i32_1 = arith.constant 0 : i32
    %c0_i32_2 = arith.constant 0 : i32
    return %c0_i32, %c0_i32_0, %c0_i32_1 : i32, i32, i32
  }
  func.func @transform_2(%arg0: i32, %arg1: i32) -> (i32, i32, i32) {
    %c0_i32 = arith.constant 0 : i32
    %c0_i32_0 = arith.constant 0 : i32
    %c0_i32_1 = arith.constant 0 : i32
    %c0_i32_2 = arith.constant 0 : i32
    return %c0_i32, %c0_i32_0, %c0_i32_1 : i32, i32, i32
  }
  func.func @transform_3(%arg0: i32, %arg1: i32) -> (i32, i32, i32) {
    %c0_i32 = arith.constant 0 : i32
    %c0_i32_0 = arith.constant 0 : i32
    return %arg0, %c0_i32, %arg1 : i32, i32, i32
  }
}

</mosaic_0001>

<bundles_post_ra>
// kernel: tpu_custom_call.1
= control target key start
LH: loop header
LB: loop body
LE: loop exit
PB: predicated region body
PF: predicated region fallthrough
CT: control target
= control target key end

     0   :  { %8 = vsyncpa [#allocation3], 0  ;;  %s690_s0 = inlined_call_operand.hbm [shape: f32[8,16,16], index: 0, kind: input, shape index: {}]   ;;  %s691_s1 = inlined_call_operand.vmem [shape: f32[1,16,1], index: 1, kind: input, shape index: {}]   ;;  %s692_s2 = inlined_call_operand.vmem [shape: f32[1,16,1], index: 2, kind: input, shape index: {}]   ;;  %s693_s3 = inlined_call_operand.hbm [shape: f32[8,16,16], index: 3, kind: output, shape index: {}]  }
   0x1   :  { %9 = vsyncpa [#allocation4], 0  ;;  %s431_s12 = smov [#allocation2]   ;;  %s383_s16 = scalar_lea.hbm %s690_s0, 2048 }
   0x2   :  { %s15_s13 = sshll.u32 %s431_s12, 4  ;;  %p384_p0 = scmp.ne.s32.totalorder %s690_s0, %s383_s16  ;;  %s16_s13 = int_to_ptr.vmem [resolvable:$true] %s15_s13 }
   0x3   :  { %p387_p1 = scmp.lt.u32.totalorder %s383_s16, %s690_s0 }
   0x5   :  { %p389_p2 = pnand %p387_p1, %p384_p0 }
   0x7   :  { %392 = shalt.err (!%p389_p2)
}
   0x8   :  { %s393_s21 = scalar_lea.vmem %s16_s13, 2048  ;;  %p398_p4 = scmp.lt.s32.totalorder %s16_s13, %s16_s13 }
   0x9   :  { %p394_p3 = scmp.ne.s32.totalorder %s16_s13, %s393_s21  ;;  %p399_p5 = scmp.lt.s32.totalorder %s393_s21, %s393_s21 }
   0xb   :  { %p400_p6 = por %p399_p5, %p398_p4 }
   0xd   :  { %p401_p7 = pnand %p400_p6, %p394_p3 }
   0xf   :  { %404 = shalt.err (!%p401_p7)
}
  0x10   :  { %s432_s22 = smov 128   ;;  %s433_s23 = smov 8  }
  0x11   :  { %21 = dma.hbm_to_vmem [thread:$0]  %s690_s0, 2048, %s16_s13, [#allocation3], %s432_s22, %s432_s22, %s433_s23  }
  0x12   :  { %427 = dma.done.wait [#allocation3], 2048  }
  0x13   :  { %428 = vsyncadd [#allocation3], 4294965248  ;;  %v434_v0 = vmov 0   ;;  %v299_v1 = vld [vmem:[%s692_s2] sm:$0xff]  ;;  %v300_v3 = vld [vmem:[%s692_s2 + $0x8] sm:$0xff]  ;;  %vm45_vm0 = vcmask 130048  }
  0x14   :  { %366 = vset.pattern.permute.xlu1 %v434_v0  ;;  %365 = vset.pattern.permute.xlu0 %v434_v0  ;;  %v271_v2 = vld [vmem:[%s691_s1] sm:$0xff]  ;;  %v272_v4 = vld [vmem:[%s691_s1 + $0x8] sm:$0xff]  ;;  %v487_v7 = vld [vmem:[#allocation2 + $0x10] sm:$0xff]  ;;  %s435_s1 = smov [#allocation5]  }
  0x15   :  { %303 = vperm.xlu1 %366, %v299_v1   ;;  %275 = vperm.xlu0 %365, %v271_v2   ;;  %v483_v5 = vld [vmem:[#allocation2] sm:$0xff]  ;;  %v485_v6 = vld [vmem:[#allocation2 + $0x8] sm:$0xff]  ;;  %v489_v8 = vld [vmem:[#allocation2 + $0x18] sm:$0xff]  ;;  %v55_v16 = vsel %vm45_vm0, %v487_v7, 0.0  ;;  %s348_s2 = sshll.u32 %s435_s1, 4  ;;  %s349_s2 = int_to_ptr.vmem [resolvable:$true] %s348_s2 }
  0x16   :  { %v491_v9 = vld [vmem:[#allocation2 + $0x20] sm:$0xff]  ;;  %v46_v10 = vsel %vm45_vm0, %v483_v5, 0.0  ;;  %v47_v11 = vsel %vm45_vm0, %v485_v6, 0.0  ;;  %v497_v12 = vld [vmem:[#allocation2 + $0x28] sm:$0xff]  ;;  %v499_v13 = vld [vmem:[#allocation2 + $0x30] sm:$0xff]  ;;  %v56_v17 = vsel %vm45_vm0, %v489_v8, 0.0  ;;  %p410_p9 = scmp.lt.s32.totalorder %s349_s2, %s349_s2 }
  0x17   :  { %v501_v14 = vld [vmem:[#allocation2 + $0x38] sm:$0xff]  ;;  %v503_v15 = vld [vmem:[#allocation2 + $0x40] sm:$0xff]  ;;  %v509_v18 = vld [vmem:[#allocation2 + $0x48] sm:$0xff]  ;;  %v48_v21 = vadd.f32 %v47_v11, %v46_v10  ;;  %v64_v24 = vsel %vm45_vm0, %v491_v9, 0.0  ;;  %v65_v25 = vsel %vm45_vm0, %v497_v12, 0.0  ;;  %v73_v26 = vsel %vm45_vm0, %v499_v13, 0.0 }
  0x18   :  { %v511_v19 = vld [vmem:[#allocation2 + $0x50] sm:$0xff]  ;;  %v513_v20 = vld [vmem:[#allocation2 + $0x58] sm:$0xff]  ;;  %v515_v22 = vld [vmem:[#allocation2 + $0x60] sm:$0xff]  ;;  %v74_v27 = vsel %vm45_vm0, %v501_v14, 0.0  ;;  %v57_v28 = vadd.f32 %v56_v17, %v55_v16  ;;  %v82_v31 = vsel %vm45_vm0, %v503_v15, 0.0  ;;  %v83_v32 = vsel %vm45_vm0, %v509_v18, 0.0 }
  0x19   :  { %308 = vperm.xlu1 %366, %v300_v3   ;;  %280 = vperm.xlu0 %365, %v272_v4   ;;  %v517_v23 = vld [vmem:[#allocation2 + $0x68] sm:$0xff]  ;;  %v527_v29 = vld [vmem:[#allocation2 + $0x70] sm:$0xff]  ;;  %v529_v30 = vld [vmem:[#allocation2 + $0x78] sm:$0xff]  ;;  %v91_v33 = vsel %vm45_vm0, %v511_v19, 0.0  ;;  %v92_v34 = vsel %vm45_vm0, %v513_v20, 0.0  ;;  %v66_v35 = vadd.f32 %v65_v25, %v64_v24  ;;  %v75_v36 = vadd.f32 %v74_v27, %v73_v26  ;;  %s405_s6 = scalar_lea.vmem %s349_s2, 2048 }
  0x1a   :  { %v100_v37 = vsel %vm45_vm0, %v515_v22, 0.0  ;;  %v101_v38 = vsel %vm45_vm0, %v517_v23, 0.0  ;;  %v49_v39 = vrot.slane %v48_v21, 4  ;;  %v84_v40 = vadd.f32 %v83_v32, %v82_v31  ;;  %p406_p8 = scmp.ne.s32.totalorder %s349_s2, %s405_s6  ;;  %p411_p10 = scmp.lt.s32.totalorder %s405_s6, %s405_s6 }
  0x1b   :  { %v93_v41 = vadd.f32 %v92_v34, %v91_v33  ;;  %v109_v42 = vsel %vm45_vm0, %v527_v29, 0.0  ;;  %v110_v43 = vsel %vm45_vm0, %v529_v30, 0.0  ;;  %v58_v44 = vrot.slane %v57_v28, 4 }
  0x1c   :  { %v102_v45 = vadd.f32 %v101_v38, %v100_v37  ;;  %v67_v46 = vrot.slane %v66_v35, 4  ;;  %v76_v47 = vrot.slane %v75_v36, 4  ;;  %v50_v48 = vadd.f32 %v49_v39, %v48_v21  ;;  %p412_p11 = por %p411_p10, %p410_p9 }
  0x1d   :  { %v111_v49 = vadd.f32 %v110_v43, %v109_v42  ;;  %v85_v50 = vrot.slane %v84_v40, 4  ;;  %v94_v51 = vrot.slane %v93_v41, 4  ;;  %v59_v52 = vadd.f32 %v58_v44, %v57_v28 }
  0x1e   :  { %v103_v53 = vrot.slane %v102_v45, 4  ;;  %v68_v54 = vadd.f32 %v67_v46, %v66_v35  ;;  %v77_v55 = vadd.f32 %v76_v47, %v75_v36  ;;  %v51_v56 = vrot.slane %v50_v48, 2  ;;  %p413_p12 = pnand %p412_p11, %p406_p8 }
  0x1f   :  { %v112_v57 = vrot.slane %v111_v49, 4  ;;  %v86_v58 = vadd.f32 %v85_v50, %v84_v40  ;;  %v95_v59 = vadd.f32 %v94_v51, %v93_v41  ;;  %v60_v60 = vrot.slane %v59_v52, 2 }
  0x20   :  { %v104_v61 = vadd.f32 %v103_v53, %v102_v45  ;;  %v69_v62 = vrot.slane %v68_v54, 2  ;;  %v78_v63 = vrot.slane %v77_v55, 2  ;;  %v52_v0 = vadd.f32 %v51_v56, %v50_v48 }
  0x21   :  { %v113_v1 = vadd.f32 %v112_v57, %v111_v49  ;;  %v87_v2 = vrot.slane %v86_v58, 2  ;;  %v96_v3 = vrot.slane %v95_v59, 2  ;;  %v61_v4 = vadd.f32 %v60_v60, %v59_v52 }
  0x22   :  { %v105_v10 = vrot.slane %v104_v61, 2  ;;  %v70_v11 = vadd.f32 %v69_v62, %v68_v54  ;;  %v79_v16 = vadd.f32 %v78_v63, %v77_v55  ;;  %v53_v17 = vrot.slane %v52_v0, 1 }
  0x23   :  { %v114_v21 = vrot.slane %v113_v1, 2  ;;  %v88_v24 = vadd.f32 %v87_v2, %v86_v58  ;;  %v97_v25 = vadd.f32 %v96_v3, %v95_v59  ;;  %v62_v26 = vrot.slane %v61_v4, 1 }
  0x24   :  { %v106_v27 = vadd.f32 %v105_v10, %v104_v61  ;;  %v71_v28 = vrot.slane %v70_v11, 1  ;;  %v80_v31 = vrot.slane %v79_v16, 1  ;;  %v54_v32 = vadd.f32 %v53_v17, %v52_v0 }
  0x25   :  { %v115_v33 = vadd.f32 %v114_v21, %v113_v1  ;;  %v89_v34 = vrot.slane %v88_v24, 1  ;;  %v98_v35 = vrot.slane %v97_v25, 1  ;;  %v63_v36 = vadd.f32 %v62_v26, %v61_v4 }
  0x26   :  { %v107_v37 = vrot.slane %v106_v27, 1  ;;  %v72_v38 = vadd.f32 %v71_v28, %v70_v11  ;;  %v81_v39 = vadd.f32 %v80_v31, %v79_v16  ;;  %v119_v41 = vmul.f32 0.0625, %v54_v32 }
  0x27   :  { %v116_v40 = vrot.slane %v115_v33, 1  ;;  %v90_v42 = vadd.f32 %v89_v34, %v88_v24  ;;  %v99_v43 = vadd.f32 %v98_v35, %v97_v25  ;;  %v120_v45 = vmul.f32 0.0625, %v63_v36 }
  0x28   :  { %v108_v44 = vadd.f32 %v107_v37, %v106_v27  ;;  %v121_v46 = vmul.f32 0.0625, %v72_v38  ;;  %v122_v47 = vmul.f32 0.0625, %v81_v39  ;;  %v548_v49 = vsub.f32 %v483_v5, %v119_v41 }
  0x29   :  { %v117_v48 = vadd.f32 %v116_v40, %v115_v33  ;;  %v551_v50 = vsub.f32 %v485_v6, %v119_v41  ;;  %v123_v51 = vmul.f32 0.0625, %v90_v42  ;;  %v124_v52 = vmul.f32 0.0625, %v99_v43 }
  0x2a   :  { %v125_v53 = vmul.f32 0.0625, %v108_v44  ;;  %v554_v54 = vsub.f32 %v487_v7, %v120_v45  ;;  %v557_v55 = vsub.f32 %v489_v8, %v120_v45  ;;  %v560_v56 = vsub.f32 %v491_v9, %v121_v46 }
  0x2b   :  { %v563_v57 = vsub.f32 %v497_v12, %v121_v46  ;;  %v566_v5 = vsub.f32 %v499_v13, %v122_v47  ;;  %v569_v6 = vsub.f32 %v501_v14, %v122_v47  ;;  %v126_v58 = vmul.f32 0.0625, %v117_v48 }
  0x2c   :  { %v143_v7 = vmul.f32 %v548_v49, %v548_v49  ;;  %v144_v8 = vmul.f32 %v551_v50, %v551_v50  ;;  %v576_v59 = vsub.f32 %v503_v15, %v123_v51  ;;  %v579_v9 = vsub.f32 %v509_v18, %v123_v51 }
  0x2d   :  { %v582_v12 = vsub.f32 %v511_v19, %v124_v52  ;;  %v585_v13 = vsub.f32 %v513_v20, %v124_v52  ;;  %v588_v14 = vsub.f32 %v515_v22, %v125_v53  ;;  %v591_v60 = vsub.f32 %v517_v23, %v125_v53 }
  0x2e   :  { %v145_v61 = vmul.f32 %v554_v54, %v554_v54  ;;  %v146_v15 = vmul.f32 %v557_v55, %v557_v55  ;;  %v147_v18 = vmul.f32 %v560_v56, %v560_v56  ;;  %v148_v19 = vmul.f32 %v563_v57, %v563_v57 }
  0x2f   :  { %v149_v20 = vmul.f32 %v566_v5, %v566_v5  ;;  %v150_v22 = vmul.f32 %v569_v6, %v569_v6  ;;  %v606_v23 = vsub.f32 %v527_v29, %v126_v58  ;;  %v609_v62 = vsub.f32 %v529_v30, %v126_v58 }
  0x30   :  { %v159_v63 = vsel %vm45_vm0, %v143_v7, 0.0  ;;  %v160_v0 = vsel %vm45_vm0, %v144_v8, 0.0  ;;  %v151_v1 = vmul.f32 %v576_v59, %v576_v59  ;;  %v152_v2 = vmul.f32 %v579_v9, %v579_v9 }
  0x31   :  { %v153_v3 = vmul.f32 %v582_v12, %v582_v12  ;;  %v154_v29 = vmul.f32 %v585_v13, %v585_v13  ;;  %v155_v30 = vmul.f32 %v588_v14, %v588_v14  ;;  %v168_v4 = vsel %vm45_vm0, %v145_v61, 0.0 }
  0x32   :  { %v169_v10 = vsel %vm45_vm0, %v146_v15, 0.0  ;;  %v156_v11 = vmul.f32 %v591_v60, %v591_v60  ;;  %v161_v16 = vadd.f32 %v160_v0, %v159_v63  ;;  %v177_v17 = vsel %vm45_vm0, %v147_v18, 0.0 }
  0x33   :  { %v178_v21 = vsel %vm45_vm0, %v148_v19, 0.0  ;;  %v157_v24 = vmul.f32 %v606_v23, %v606_v23  ;;  %v158_v25 = vmul.f32 %v609_v62, %v609_v62  ;;  %v186_v26 = vsel %vm45_vm0, %v149_v20, 0.0 }
  0x34   :  { %v187_v27 = vsel %vm45_vm0, %v150_v22, 0.0  ;;  %v170_v28 = vadd.f32 %v169_v10, %v168_v4  ;;  %v195_v31 = vsel %vm45_vm0, %v151_v1, 0.0  ;;  %v196_v32 = vsel %vm45_vm0, %v152_v2, 0.0 }
  0x35   :  { %v179_v33 = vadd.f32 %v178_v21, %v177_v17  ;;  %v204_v34 = vsel %vm45_vm0, %v153_v3, 0.0  ;;  %v205_v35 = vsel %vm45_vm0, %v154_v29, 0.0  ;;  %v188_v36 = vadd.f32 %v187_v27, %v186_v26 }
  0x36   :  { %v213_v37 = vsel %vm45_vm0, %v155_v30, 0.0  ;;  %v214_v38 = vsel %vm45_vm0, %v156_v11, 0.0  ;;  %v162_v39 = vrot.slane %v161_v16, 4  ;;  %v197_v40 = vadd.f32 %v196_v32, %v195_v31 }
  0x37   :  { %v222_v41 = vsel %vm45_vm0, %v157_v24, 0.0  ;;  %v223_v42 = vsel %vm45_vm0, %v158_v25, 0.0  ;;  %v171_v43 = vrot.slane %v170_v28, 4  ;;  %v206_v44 = vadd.f32 %v205_v35, %v204_v34 }
  0x38   :  { %v180_v45 = vrot.slane %v179_v33, 4  ;;  %v215_v46 = vadd.f32 %v214_v38, %v213_v37  ;;  %v189_v47 = vrot.slane %v188_v36, 4  ;;  %v224_v48 = vadd.f32 %v223_v42, %v222_v41 }
  0x39   :  { %v163_v51 = vadd.f32 %v162_v39, %v161_v16  ;;  %v198_v52 = vrot.slane %v197_v40, 4  ;;  %v172_v53 = vadd.f32 %v171_v43, %v170_v28  ;;  %v207_v58 = vrot.slane %v206_v44, 4 }
  0x3a   :  { %v181_v7 = vadd.f32 %v180_v45, %v179_v33  ;;  %v216_v8 = vrot.slane %v215_v46, 4  ;;  %v190_v61 = vadd.f32 %v189_v47, %v188_v36  ;;  %v225_v15 = vrot.slane %v224_v48, 4 }
  0x3b   :  { %v164_v18 = vrot.slane %v163_v51, 2  ;;  %v199_v19 = vadd.f32 %v198_v52, %v197_v40  ;;  %v173_v20 = vrot.slane %v172_v53, 2  ;;  %v208_v22 = vadd.f32 %v207_v58, %v206_v44 }
  0x3c   :  { %v182_v63 = vrot.slane %v181_v7, 2  ;;  %v217_v0 = vadd.f32 %v216_v8, %v215_v46  ;;  %v191_v1 = vrot.slane %v190_v61, 2  ;;  %v226_v2 = vadd.f32 %v225_v15, %v224_v48 }
  0x3d   :  { %v165_v3 = vadd.f32 %v164_v18, %v163_v51  ;;  %v200_v29 = vrot.slane %v199_v19, 2  ;;  %v174_v30 = vadd.f32 %v173_v20, %v172_v53  ;;  %v209_v4 = vrot.slane %v208_v22, 2 }
  0x3e   :  { %v183_v10 = vadd.f32 %v182_v63, %v181_v7  ;;  %v218_v11 = vrot.slane %v217_v0, 2  ;;  %v192_v16 = vadd.f32 %v191_v1, %v190_v61  ;;  %v227_v17 = vrot.slane %v226_v2, 2 }
  0x3f   :  { %v166_v21 = vrot.slane %v165_v3, 1  ;;  %v201_v24 = vadd.f32 %v200_v29, %v199_v19  ;;  %v175_v25 = vrot.slane %v174_v30, 1  ;;  %v210_v26 = vadd.f32 %v209_v4, %v208_v22 }
  0x40   :  { %v184_v27 = vrot.slane %v183_v10, 1  ;;  %v219_v28 = vadd.f32 %v218_v11, %v217_v0  ;;  %v193_v31 = vrot.slane %v192_v16, 1  ;;  %v228_v32 = vadd.f32 %v227_v17, %v226_v2 }
  0x41   :  { %v167_v33 = vadd.f32 %v166_v21, %v165_v3  ;;  %v202_v34 = vrot.slane %v201_v24, 1  ;;  %v176_v35 = vadd.f32 %v175_v25, %v174_v30  ;;  %v211_v36 = vrot.slane %v210_v26, 1 }
  0x42   :  { %v185_v37 = vadd.f32 %v184_v27, %v183_v10  ;;  %v220_v38 = vrot.slane %v219_v28, 1  ;;  %v194_v39 = vadd.f32 %v193_v31, %v192_v16  ;;  %v229_v40 = vrot.slane %v228_v32, 1 }
  0x43   :  { %v203_v41 = vadd.f32 %v202_v34, %v201_v24  ;;  %v231_v42 = vmul.f32 0.0625, %v167_v33  ;;  %v212_v43 = vadd.f32 %v211_v36, %v210_v26  ;;  %v232_v44 = vmul.f32 0.0625, %v176_v35 }
  0x44   :  { %v221_v45 = vadd.f32 %v220_v38, %v219_v28  ;;  %v233_v46 = vmul.f32 0.0625, %v185_v37  ;;  %v230_v47 = vadd.f32 %v229_v40, %v228_v32  ;;  %v234_v48 = vmul.f32 0.0625, %v194_v39 }
  0x45   :  { %v235_v51 = vmul.f32 0.0625, %v203_v41  ;;  %v239_v52 = vadd.f32 1e-05, %v231_v42  ;;  %v236_v53 = vmul.f32 0.0625, %v212_v43  ;;  %v240_v58 = vadd.f32 1e-05, %v232_v44 }
  0x46   :  { %v237_v7 = vmul.f32 0.0625, %v221_v45  ;;  %v241_v8 = vadd.f32 1e-05, %v233_v46  ;;  %v238_v61 = vmul.f32 0.0625, %v230_v47  ;;  %v242_v15 = vadd.f32 1e-05, %v234_v48 }
  0x47   :  { %v243_v18 = vadd.f32 1e-05, %v235_v51  ;;  %367 = vrsqrt.f32 %v239_v52  ;;  %v244_v19 = vadd.f32 1e-05, %v236_v53 }
  0x48   :  { %369 = vrsqrt.f32 %v240_v58  ;;  %v245_v20 = vadd.f32 1e-05, %v237_v7  ;;  %v246_v22 = vadd.f32 1e-05, %v238_v61 }
  0x49   :  { %371 = vrsqrt.f32 %v241_v8 }
  0x4a   :  { %373 = vrsqrt.f32 %v242_v15 }
  0x4b   :  { %375 = vrsqrt.f32 %v243_v18 }
  0x4c   :  { %377 = vrsqrt.f32 %v244_v19 }
  0x4d   :  { %379 = vrsqrt.f32 %v245_v20 }
  0x4e   :  { %381 = vrsqrt.f32 %v246_v22 }
  0x51   :  { %v368_v63 = vpop.eup %367 }
  0x52   :  { %v370_v0 = vpop.eup %369  ;;  %v255_v10 = vmul.f32 %v368_v63, %v548_v49  ;;  %v256_v27 = vmul.f32 %v368_v63, %v551_v50 }
  0x53   :  { %v372_v1 = vpop.eup %371  ;;  %v257_v11 = vmul.f32 %v370_v0, %v554_v54  ;;  %v258_v28 = vmul.f32 %v370_v0, %v557_v55 }
  0x54   :  { %v374_v2 = vpop.eup %373  ;;  %v259_v16 = vmul.f32 %v372_v1, %v560_v56  ;;  %v260_v49 = vmul.f32 %v372_v1, %v563_v57 }
  0x55   :  { %v376_v3 = vpop.eup %375  ;;  %v261_v17 = vmul.f32 %v374_v2, %v566_v5  ;;  %v262_v54 = vmul.f32 %v374_v2, %v569_v6 }
  0x56   :  { %v378_v29 = vpop.eup %377  ;;  %v263_v21 = vmul.f32 %v376_v3, %v576_v59  ;;  %v264_v5 = vmul.f32 %v376_v3, %v579_v9 }
  0x57   :  { %v380_v30 = vpop.eup %379  ;;  %v265_v24 = vmul.f32 %v378_v29, %v582_v12  ;;  %v266_v59 = vmul.f32 %v378_v29, %v585_v13 }
  0x58   :  { %v382_v4 = vpop.eup %381  ;;  %v267_v25 = vmul.f32 %v380_v30, %v588_v14  ;;  %v268_v12 = vmul.f32 %v380_v30, %v591_v60 }
  0x59   :  { %v269_v26 = vmul.f32 %v382_v4, %v606_v23  ;;  %v270_v14 = vmul.f32 %v382_v4, %v609_v62 }
  0x94   :  { %v304_v31 = vpop.permute.xlu1 %303  ;;  %v276_v56 = vpop.permute.xlu0 %275 }
  0x95   :  { %v283_v32 = vmul.f32 %v276_v56, %v255_v10  ;;  %v285_v23 = vmul.f32 %v276_v56, %v257_v11  ;;  %v287_v33 = vmul.f32 %v276_v56, %v259_v16  ;;  %v289_v50 = vmul.f32 %v276_v56, %v261_v17 }
  0x96   :  { %v291_v34 = vmul.f32 %v276_v56, %v263_v21  ;;  %v293_v55 = vmul.f32 %v276_v56, %v265_v24  ;;  %v295_v35 = vmul.f32 %v276_v56, %v267_v25  ;;  %v297_v57 = vmul.f32 %v276_v56, %v269_v26 }
  0x97   :  { %v311_v36 = vadd.f32 %v304_v31, %v283_v32  ;;  %v313_v6 = vadd.f32 %v304_v31, %v285_v23  ;;  %v315_v37 = vadd.f32 %v304_v31, %v287_v33  ;;  %v317_v38 = vadd.f32 %v304_v31, %v289_v50 }
  0x98   :  { %v281_v39 = vpop.permute.xlu0 %280  ;;  %v319_v9 = vadd.f32 %v304_v31, %v291_v34  ;;  %v321_v40 = vadd.f32 %v304_v31, %v293_v55  ;;  %v323_v13 = vadd.f32 %v304_v31, %v295_v35  ;;  %v325_v41 = vadd.f32 %v304_v31, %v297_v57  ;;  %v309_v44 = vpop.permute.xlu1 %308 }
  0x99   :  { %v284_v60 = vmul.f32 %v281_v39, %v256_v27  ;;  %v286_v42 = vmul.f32 %v281_v39, %v258_v28  ;;  %v288_v62 = vmul.f32 %v281_v39, %v260_v49  ;;  %v290_v43 = vmul.f32 %v281_v39, %v262_v54  ;;  %327 = vst.msk [vmem:[#allocation5] sm:$0xff] %vm45_vm0, %v311_v36 }
  0x9a   :  { %329 = vst.msk [vmem:[#allocation5 + $0x10] sm:$0xff] %vm45_vm0, %v313_v6  ;;  %331 = vst.msk [vmem:[#allocation5 + $0x20] sm:$0xff] %vm45_vm0, %v315_v37  ;;  %v292_v45 = vmul.f32 %v281_v39, %v264_v5  ;;  %v294_v46 = vmul.f32 %v281_v39, %v266_v59  ;;  %v296_v47 = vmul.f32 %v281_v39, %v268_v12 }
  0x9b   :  { %333 = vst.msk [vmem:[#allocation5 + $0x30] sm:$0xff] %vm45_vm0, %v317_v38  ;;  %v298_v48 = vmul.f32 %v281_v39, %v270_v14  ;;  %335 = vst.msk [vmem:[#allocation5 + $0x40] sm:$0xff] %vm45_vm0, %v319_v9  ;;  %v312_v51 = vadd.f32 %v309_v44, %v284_v60  ;;  %v314_v52 = vadd.f32 %v309_v44, %v286_v42 }
  0x9c   :  { %337 = vst.msk [vmem:[#allocation5 + $0x50] sm:$0xff] %vm45_vm0, %v321_v40  ;;  %339 = vst.msk [vmem:[#allocation5 + $0x60] sm:$0xff] %vm45_vm0, %v323_v13  ;;  %v316_v53 = vadd.f32 %v309_v44, %v288_v62  ;;  %v318_v58 = vadd.f32 %v309_v44, %v290_v43  ;;  %v320_v7 = vadd.f32 %v309_v44, %v292_v45 }
  0x9d   :  { %341 = vst.msk [vmem:[#allocation5 + $0x70] sm:$0xff] %vm45_vm0, %v325_v41  ;;  %v322_v8 = vadd.f32 %v309_v44, %v294_v46  ;;  %v324_v61 = vadd.f32 %v309_v44, %v296_v47  ;;  %v326_v15 = vadd.f32 %v309_v44, %v298_v48  ;;  %328 = vst.msk [vmem:[#allocation5 + $0x8] sm:$0xff] %vm45_vm0, %v312_v51 }
  0x9e   :  { %330 = vst.msk [vmem:[#allocation5 + $0x18] sm:$0xff] %vm45_vm0, %v314_v52  ;;  %332 = vst.msk [vmem:[#allocation5 + $0x28] sm:$0xff] %vm45_vm0, %v316_v53 }
  0x9f   :  { %334 = vst.msk [vmem:[#allocation5 + $0x38] sm:$0xff] %vm45_vm0, %v318_v58  ;;  %336 = vst.msk [vmem:[#allocation5 + $0x48] sm:$0xff] %vm45_vm0, %v320_v7 }
  0xa0   :  { %338 = vst.msk [vmem:[#allocation5 + $0x58] sm:$0xff] %vm45_vm0, %v322_v8  ;;  %340 = vst.msk [vmem:[#allocation5 + $0x68] sm:$0xff] %vm45_vm0, %v324_v61 }
  0xa1   :  { %342 = vst.msk [vmem:[#allocation5 + $0x78] sm:$0xff] %vm45_vm0, %v326_v15 }
  0xa2   :  { %416 = shalt.err (!%p413_p12)
}
  0xa3   :  { %s417_s9 = scalar_lea.hbm %s693_s3, 2048 }
  0xa4   :  { %p418_p13 = scmp.ne.s32.totalorder %s693_s3, %s417_s9  ;;  %p421_p0 = scmp.lt.u32.totalorder %s417_s9, %s693_s3 }
  0xa6   :  { %p423_p1 = pnand %p421_p0, %p418_p13 }
  0xa8   :  { %426 = shalt.err (!%p423_p1)
}
  0xa9   :  { %354 = dma.vmem_to_hbm [thread:$0]  %s349_s2, 2048, %s693_s3, [#allocation4], %s432_s22, %s432_s22, %s433_s23  }
  0xaa   :  { %429 = dma.done.wait [#allocation4], 2048  }
  0xab   :  { %430 = vsyncadd [#allocation4], 4294965248 }
  0xac   :  { %358 = vsyncpa [#allocation3], 1 }
  0xad   :  { %359 = vsyncpa [#allocation4], 1 }

</bundles_post_ra>
